<compile_context>
chip_gen: v5e
topology: v5e:2x2
jax: 0.10.0
libtpu: 0.0.40
codegen_flags: <defaults>
</compile_context>

<pallas_src>
import functools

import jax
import jax.numpy as jnp
from jax import lax
from jax.experimental import pallas as pl
from jax.experimental.pallas import tpu as pltpu


def _round_up(x: int, m: int) -> int:
    return ((x + m - 1) // m) * m


@functools.lru_cache(maxsize=1)
def _vmem_capacity_bytes() -> int:
    """Per-core VMEM capacity; conservative (v7x) fallback if unqueryable."""
    try:
        return int(pltpu.get_tpu_info().vmem_capacity_bytes)
    except Exception:
        return 64 * 1024 * 1024


def _make_classification_kernel(pooling: str, n_true: int, tn: int, mask_needed: bool):
    """Fused pooling + linear kernel body (accumulator pattern over N tiles)."""

    def kernel(x_ref, w_ref, b_ref, o_ref, acc_ref):
        # x_ref:   (TB, TN, H)  node-representation tile (streamed, UNPADDED array)
        # w_ref:   (H, Tp)      resident linear weight (transposed, T zero-padded)
        # b_ref:   (1, Tp)      resident linear bias (zero-padded)
        # o_ref:   (TB, Tp)     f32 graph-level predictions tile (resident over N)
        # acc_ref: (TB, H)      f32 pooling accumulator (scratch)
        n = pl.program_id(1)

        @pl.when(n == 0)
        def _init():
            if pooling == "max":
                acc_ref[...] = jnp.full(acc_ref.shape, -jnp.inf, acc_ref.dtype)
            else:
                acc_ref[...] = jnp.zeros(acc_ref.shape, acc_ref.dtype)

        x = x_ref[...].astype(jnp.float32)  # f32 accumulation (also needed on v5e)
        if mask_needed:
            # Ragged last N tile: invalidate out-of-range node slots in-kernel
            # (0 for sum/mean, -inf for max) instead of padding the input in HBM.
            node_idx = n * tn + lax.broadcasted_iota(
                jnp.int32, (1, tn, x.shape[-1]), 1
            )
            fill = -jnp.inf if pooling == "max" else 0.0
            x = jnp.where(node_idx < n_true, x, jnp.float32(fill))

        if pooling == "max":
            acc_ref[...] = jnp.maximum(acc_ref[...], jnp.max(x, axis=1))
        else:  # sum / mean share the running-sum accumulator
            acc_ref[...] = acc_ref[...] + jnp.sum(x, axis=1)

        @pl.when(n == pl.num_programs(1) - 1)
        def _finalize():
            pooled = acc_ref[...]
            if pooling == "mean":
                pooled = pooled * jnp.float32(1.0 / n_true)  # divide by the TRUE N once
            out = jnp.dot(pooled, w_ref[...], preferred_element_type=jnp.float32)
            o_ref[...] = (out + b_ref[...]).astype(o_ref.dtype)

    return kernel


@functools.partial(jax.jit, static_argnames=("pooling",))
def classification_forward(node_rep, weight_t, bias, *, pooling="mean"):
    """Pallas forward pass of the Classification head.

    node_rep : (B, N, H) backbone output (f32 or bf16 -- streamed as-is)
    weight_t : (H, T)    transposed nn.Linear weight
    bias     : (T,)      nn.Linear bias
    returns  : (B, T)    f32 logits
    """
    if pooling not in ("sum", "mean", "max"):
        raise ValueError("Invalid graph pooling type.")

    B, N, H = node_rep.shape
    T = weight_t.shape[1]
    itemsize = jnp.dtype(node_rep.dtype).itemsize

    # Lane-dense output / weight columns (tiny pad; the big input is NOT padded).
    Tp = _round_up(T, 128)

    # ---- batch tiling -------------------------------------------------------
    if B > 8:
        TB = 8          # >= 2 batch tiles -> "parallel" axis feeds both v7x TCs
    else:
        TB = B          # single full-dim batch tile (satisfies block constraints)
    Bo = _round_up(B, TB)          # output rows padded to a tile multiple (tiny)
    grid_b = Bo // TB

    # ---- node tiling: generation-gated VMEM budget --------------------------
    vmem = _vmem_capacity_bytes()
    if vmem >= 128 * 1024 * 1024:          # v5e / v6e: 128 MiB physical VMEM
        tile_budget = 16 * 1024 * 1024     # per x-tile buffer (x2 double-buffered)
        tn_cap = 2048
        vmem_limit = 96 * 1024 * 1024
    else:                                  # v7x: 64 MiB phys / 32 MiB scoped
        tile_budget = 10 * 1024 * 1024
        tn_cap = 512
        vmem_limit = 32 * 1024 * 1024

    # Sublane packing: 8 rows (f32), 16 (bf16), 32 (int8 / fp8).
    tn_align = 8 * max(1, 4 // itemsize)
    max_tn = max(
        tn_align,
        (tile_budget // max(1, TB * H * itemsize)) // tn_align * tn_align,
    )
    TN = min(_round_up(N, tn_align), max_tn, tn_cap)
    grid_n = pl.cdiv(N, TN)
    mask_needed = (N % TN) != 0

    # Weight / bias: pad only the task dim to Tp (one-time, tiny).
    w_p = jnp.pad(weight_t, ((0, 0), (0, Tp - T))) if Tp != T else weight_t
    b_p = (jnp.pad(bias, (0, Tp - T)) if Tp != T else bias).reshape(1, Tp)

    out = pl.pallas_call(
        _make_classification_kernel(pooling, N, TN, mask_needed),
        out_shape=jax.ShapeDtypeStruct((Bo, Tp), jnp.float32),
        grid_spec=pltpu.PrefetchScalarGridSpec(
            num_scalar_prefetch=0,
            grid=(grid_b, grid_n),
            in_specs=[
                pl.BlockSpec((TB, TN, H), lambda b, n: (b, n, 0)),  # streamed input
                pl.BlockSpec((H, Tp), lambda b, n: (0, 0)),         # resident weight
                pl.BlockSpec((1, Tp), lambda b, n: (0, 0)),         # resident bias
            ],
            out_specs=pl.BlockSpec((TB, Tp), lambda b, n: (b, 0)),  # resident over N
            scratch_shapes=[pltpu.VMEM((TB, H), jnp.float32)],
        ),
        compiler_params=pltpu.CompilerParams(
            dimension_semantics=("parallel", "arbitrary"),
            vmem_limit_bytes=vmem_limit,
        ),
    )(node_rep, w_p, b_p)

    return out[:B, :T]


def _reference_forward(node_rep, weight_t, bias, pooling):
    x = node_rep.astype(jnp.float32)
    if pooling == "sum":
        pooled = jnp.sum(x, axis=1)
    elif pooling == "mean":
        pooled = jnp.mean(x, axis=1)
    elif pooling == "max":
        pooled = jnp.max(x, axis=1)
    else:
        raise ValueError("Invalid graph pooling type.")
    return pooled @ weight_t.astype(jnp.float32) + bias.astype(jnp.float32)[None, :]


if __name__ == "__main__":
    key = jax.random.PRNGKey(0)
    k_x, k_w, k_b, k_x2 = jax.random.split(key, 4)

    # Config-consistent small shapes: batch=2, nodes(seq)=8, hidden_dim=32, num_tasks=3.
    B, N, H, T = 2, 8, 32, 3

    # node_representation = self.model(x, pos, batch)  (backbone output, synthetic here)
    node_rep = jax.random.normal(k_x, (B, N, H), dtype=jnp.float32)

    # Deterministic nn.Linear(hidden_dim, num_tasks) parameters, kept as (H, T).
    bound = 1.0 / jnp.sqrt(jnp.float32(H))
    weight_t = jax.random.uniform(k_w, (H, T), jnp.float32, -bound, bound)
    bias = jax.random.uniform(k_b, (T,), jnp.float32, -bound, bound)

    for pooling in ("mean", "sum", "max"):  # config.model.graph_pooling = "mean"
        out = jax.block_until_ready(
            classification_forward(node_rep, weight_t, bias, pooling=pooling)
        )
        ref = _reference_forward(node_rep, weight_t, bias, pooling)
        assert out.shape == (B, T), (pooling, out.shape)
        assert jnp.allclose(out, ref, atol=1e-4, rtol=1e-4), (pooling, out, ref)

    # Ragged batch / node extents (exercise in-kernel N masking + batch tiling)
    # and bf16 streaming with in-kernel f32 accumulation.
    B2, N2 = 10, 50
    node_rep2_f32 = jax.random.normal(k_x2, (B2, N2, H), dtype=jnp.float32)
    node_rep2_bf16 = node_rep2_f32.astype(jnp.bfloat16)
    for x2 in (node_rep2_f32, node_rep2_bf16):
        for pooling in ("mean", "sum", "max"):
            out = jax.block_until_ready(
                classification_forward(x2, weight_t, bias, pooling=pooling)
            )
            ref = _reference_forward(x2, weight_t, bias, pooling)
            assert out.shape == (B2, T), (pooling, out.shape)
            assert jnp.allclose(out, ref, atol=1e-4, rtol=1e-4), (pooling, out, ref)

    print("KERNEL_OK")
</pallas_src>

<mosaic_0001>
module attributes {stable_mosaic.version = 11 : i64} {
  func.func @kernel(%arg0: i32, %arg1: i32, %arg2: memref<2x8x32xf32, #tpu.memory_space<vmem>>, %arg3: memref<32x128xf32, #tpu.memory_space<vmem>>, %arg4: memref<1x128xf32, #tpu.memory_space<vmem>>, %arg5: memref<2x128xf32, #tpu.memory_space<vmem>>, %arg6: memref<2x32xf32, #tpu.memory_space<vmem>>) attributes {dimension_semantics = [#tpu.dimension_semantics<parallel>, #tpu.dimension_semantics<arbitrary>], iteration_bounds = array<i64: 1, 1>, scalar_prefetch = 0 : i64, scratch_operands = 1 : i64, tpu.core_type = #tpu.core_type<tc>, window_params = [{transform_indices = @transform_0, window_bounds = array<i64: 2, 8, 32>}, {pipeline_mode = #tpu.pipeline_mode<synchronous>, transform_indices = @transform_1, window_bounds = array<i64: 32, 128>}, {pipeline_mode = #tpu.pipeline_mode<synchronous>, transform_indices = @transform_2, window_bounds = array<i64: 1, 128>}, {transform_indices = @transform_3, window_bounds = array<i64: 2, 128>}]} {
    %c0_i32 = arith.constant 0 : i32
    %0 = arith.cmpi eq, %arg1, %c0_i32 : i32
    %1 = arith.extui %0 : i1 to i32
    %c0_i32_0 = arith.constant 0 : i32
    %2 = arith.cmpi ne, %1, %c0_i32_0 : i32
    scf.if %2 {
      %cst_9 = arith.constant 0.000000e+00 : f32
      %11 = vector.broadcast %cst_9 : f32 to vector<2x32xf32>
      %c0_10 = arith.constant 0 : index
      %c0_11 = arith.constant 0 : index
      %12 = vector.load %arg6[%c0_10, %c0_11] : memref<2x32xf32, #tpu.memory_space<vmem>>, vector<2x32xf32>
      tpu.vector_store %arg6[%c0_10, %c0_11], %11 {strides = array<i32>} : memref<2x32xf32, #tpu.memory_space<vmem>>, vector<2x32xf32>,
    } else {
    }
    %c0 = arith.constant 0 : index
    %c0_1 = arith.constant 0 : index
    %c0_2 = arith.constant 0 : index
    %3 = vector.load %arg2[%c0, %c0_1, %c0_2] : memref<2x8x32xf32, #tpu.memory_space<vmem>>, vector<2x8x32xf32>
    %c0_3 = arith.constant 0 : index
    %c0_4 = arith.constant 0 : index
    %4 = vector.load %arg6[%c0_3, %c0_4] : memref<2x32xf32, #tpu.memory_space<vmem>>, vector<2x32xf32>
    %cst = arith.constant dense<0.000000e+00> : vector<2x32xf32>
    %5 = vector.multi_reduction <add>, %3, %cst [1] : vector<2x8x32xf32> to vector<2x32xf32>
    %6 = arith.addf %4, %5 : vector<2x32xf32>
    %c0_5 = arith.constant 0 : index
    %c0_6 = arith.constant 0 : index
    %7 = vector.load %arg6[%c0_5, %c0_6] : memref<2x32xf32, #tpu.memory_space<vmem>>, vector<2x32xf32>
    tpu.vector_store %arg6[%c0_5, %c0_6], %6 {strides = array<i32>} : memref<2x32xf32, #tpu.memory_space<vmem>>, vector<2x32xf32>,
    %c0_i32_7 = arith.constant 0 : i32
    %8 = arith.cmpi eq, %arg1, %c0_i32_7 : i32
    %9 = arith.extui %8 : i1 to i32
    %c0_i32_8 = arith.constant 0 : i32
    %10 = arith.cmpi ne, %9, %c0_i32_8 : i32
    scf.if %10 {
      %c0_9 = arith.constant 0 : index
      %c0_10 = arith.constant 0 : index
      %11 = vector.load %arg6[%c0_9, %c0_10] : memref<2x32xf32, #tpu.memory_space<vmem>>, vector<2x32xf32>
      %cst_11 = arith.constant 1.250000e-01 : f32
      %12 = vector.broadcast %cst_11 : f32 to vector<2x32xf32>
      %13 = arith.mulf %11, %12 : vector<2x32xf32>
      %c0_12 = arith.constant 0 : index
      %c0_13 = arith.constant 0 : index
      %14 = vector.load %arg3[%c0_12, %c0_13] : memref<32x128xf32, #tpu.memory_space<vmem>>, vector<32x128xf32>
      %cst_14 = arith.constant dense<0.000000e+00> : vector<2x128xf32>
      %15 = tpu.matmul %13, %14, %cst_14 {dimension_numbers = #tpu.dot_dimension_numbers<[1], [0], [0], [1], [0, 0, 1, 1], [], []>} : vector<2x32xf32>, vector<32x128xf32>, vector<2x128xf32> -> vector<2x128xf32>
      %c0_15 = arith.constant 0 : index
      %c0_16 = arith.constant 0 : index
      %16 = vector.load %arg4[%c0_15, %c0_16] : memref<1x128xf32, #tpu.memory_space<vmem>>, vector<1x128xf32>
      %17 = vector.broadcast %16 : vector<1x128xf32> to vector<2x128xf32>
      %18 = arith.addf %15, %17 : vector<2x128xf32>
      %c0_17 = arith.constant 0 : index
      %c0_18 = arith.constant 0 : index
      %19 = vector.load %arg5[%c0_17, %c0_18] : memref<2x128xf32, #tpu.memory_space<vmem>>, vector<2x128xf32>
      tpu.vector_store %arg5[%c0_17, %c0_18], %18 {strides = array<i32>} : memref<2x128xf32, #tpu.memory_space<vmem>>, vector<2x128xf32>,
    } else {
    }
    return
  }
  func.func @transform_0(%arg0: i32, %arg1: i32) -> (i32, i32, i32) {
    %c0_i32 = arith.constant 0 : i32
    %c0_i32_0 = arith.constant 0 : i32
    return %arg0, %arg1, %c0_i32 : i32, i32, i32
  }
  func.func @transform_1(%arg0: i32, %arg1: i32) -> (i32, i32) {
    %c0_i32 = arith.constant 0 : i32
    %c0_i32_0 = arith.constant 0 : i32
    %c0_i32_1 = arith.constant 0 : i32
    return %c0_i32, %c0_i32_0 : i32, i32
  }
  func.func @transform_2(%arg0: i32, %arg1: i32) -> (i32, i32) {
    %c0_i32 = arith.constant 0 : i32
    %c0_i32_0 = arith.constant 0 : i32
    %c0_i32_1 = arith.constant 0 : i32
    return %c0_i32, %c0_i32_0 : i32, i32
  }
  func.func @transform_3(%arg0: i32, %arg1: i32) -> (i32, i32) {
    %c0_i32 = arith.constant 0 : i32
    %c0_i32_0 = arith.constant 0 : i32
    return %arg0, %c0_i32 : i32, i32
  }
}

</mosaic_0001>

<bundles_post_ra>
// kernel: classification_forward.1
= control target key start
LH: loop header
LB: loop body
LE: loop exit
PB: predicated region body
PF: predicated region fallthrough
CT: control target
= control target key end

     0   :  { %vm19_vm0 = vcmask 254976   ;;  %vm24_vm1 = vcmask 261120   ;;  %v130_v2 = vmov 0.0   ;;  %s181_s0 = inlined_call_operand.vmem [shape: f32[2,8,32], index: 0, kind: input, shape index: {}]   ;;  %s182_s1 = inlined_call_operand.vmem [shape: f32[32,128], index: 1, kind: input, shape index: {}]   ;;  %s183_s2 = inlined_call_operand.vmem [shape: f32[1,128], index: 2, kind: input, shape index: {}]   ;;  %s184_s3 = inlined_call_operand.hbm [shape: f32[2,128], index: 3, kind: output, shape index: {}]  }
   0x1   :  { %v55_v0 = vld [vmem:[%s182_s1 + $0x18] sm:$0xff]  ;;  %v54_v1 = vld [vmem:[%s182_s1 + $0x10] sm:$0xff]  ;;  %20 = vst.msk [vmem:[#allocation2] sm:$0x3] %vm19_vm0, %v130_v2  ;;  %v21_v3 = vld [vmem:[%s181_s0] sm:$0xff] }
   0x2   :  { %75 = vmatpush.msra.mxu0 %v55_v0  ;;  %v22_v4 = vld [vmem:[%s181_s0 + $0x8] sm:$0xff]  ;;  %v25_v6 = vsel %vm24_vm1, %v21_v3, 0.0 }
   0x3   :  { %v53_v5 = vld [vmem:[%s182_s1 + $0x8] sm:$0xff]  ;;  %v32_v7 = vsel %vm24_vm1, %v22_v4, 0.0  ;;  %v26_v8 = vrot.slane %v25_v6, 4 }
   0x4   :  { %76 = vmatpush.msra.mxu0 %v54_v1  ;;  %v33_v9 = vrot.slane %v32_v7, 4 }
   0x5   :  { %8 = vsyncpa [#allocation4], 0  ;;  %v52_v10 = vld [vmem:[%s182_s1] sm:$0xff]  ;;  %v27_v11 = vadd.f32 %v26_v8, %v25_v6  ;;  %vm41_vm2 = vcmask 1041409   ;;  %s131_s24 = smov [#allocation3]   ;;  %s91_s28 = sshll.u32 %s184_s3, 4  ;;  %s92_s28 = int_to_ptr.hbm [resolvable:$true] %s91_s28 }
   0x6   :  { %77 = vmatpush.msra.mxu0 %v53_v5  ;;  %v34_v12 = vadd.f32 %v33_v9, %v32_v7  ;;  %v103_v26 = vld [vmem:[%s183_s2] ss:$0 sm:$0xff]  ;;  %s89_s25 = sshll.u32 %s131_s24, 4  ;;  %s90_s25 = int_to_ptr.vmem [resolvable:$true] %s89_s25 }
   0x7   :  { %v28_v13 = vrot.slane %v27_v11, 2 }
   0x8   :  { %78 = vmatpush.msra.mxu0 %v52_v10  ;;  %v35_v14 = vrot.slane %v34_v12, 2  ;;  %v23_v19 = vld [vmem:[#allocation2] sm:$0x3] }
   0x9   :  { %v29_v15 = vadd.f32 %v28_v13, %v27_v11 }
   0xa   :  { %v36_v16 = vadd.f32 %v35_v14, %v34_v12 }
   0xb   :  { %v30_v17 = vrot.slane %v29_v15, 1 }
   0xc   :  { %v37_v18 = vrot.slane %v36_v16, 1 }
   0xd   :  { %v31_v20 = vadd.f32 %v30_v17, %v29_v15 }
   0xe   :  { %v38_v21 = vadd.f32 %v37_v18, %v36_v16 }
  0x10   :  { %v42_v22 = vsel %vm41_vm2, %v38_v21, %v31_v20 }
  0x11   :  { %v44_v23 = vadd.f32 %v42_v22, %v23_v19 }
  0x13   :  { %46 = vst.msk [vmem:[#allocation2] sm:$0x3] %vm19_vm0, %v44_v23 }
  0x1a   :  { %v50_v24 = vld [vmem:[#allocation2] sm:$0x3] }
  0x1b   :  { %v51_v25 = vmul.f32 0.125, %v50_v24 }
  0x1d   :  { %100 = vmatmul.msk.f32.vlgmr.msra.gmra.mxu0 %vm24_vm1, %v51_v25 }
  0x9a   :  { %v80_v27 = vpop.f32.mrf.mxu0 }
  0x9b   :  { %v81_v28 = vadd.f32 %v103_v26, %v80_v27 }
  0x9d   :  { %83 = vst [vmem:[#allocation3] sm:$0x3] %v81_v28 }
  0x9e   :  { %94 = dma.vmem_to_hbm [thread:$0]  %s90_s25, 32, %s92_s28, [#allocation4]  }
  0x9f   :  { %128 = dma.done.wait [#allocation4], 32  }
  0xa0   :  { %129 = vsyncadd [#allocation4], 4294967264 }
  0xa1   :  { %99 = vsyncpa [#allocation4], 1 }

</bundles_post_ra>
